<compile_context>
chip_gen: v6e
topology: v6e:2x2x1
jax: 0.10.0
libtpu: 0.0.40
codegen_flags: <defaults>
</compile_context>

<pallas_src>
import jax
import jax.numpy as jnp
from jax.experimental import pallas as pl


# ----------------------------- packed-weight layout ---------------------------
_WEIGHT_ORDER = ("wih0", "whh0", "b0", "w1", "b1", "w2", "b2", "fcw", "fcb")


def _round8(n):
    return ((n + 7) // 8) * 8


def _pack_layout(D, H):
    """Row offsets (8-aligned) of each block inside the packed (rows, H) buffer."""
    rows = {
        "wih0": D, "whh0": H, "b0": 1,
        "w1": 2 * H, "b1": 1,          # [Wih1; Whh1] stacked -> fused concat matmul
        "w2": 2 * H, "b2": 1,          # [Wih2; Whh2]
        "fcw": H, "fcb": 1,
    }
    layout, off = {}, 0
    for name in _WEIGHT_ORDER:
        layout[name] = (off, rows[name])
        off += _round8(rows[name])
    return layout, off


# ------------------------------ fused kernel ---------------------------------
def fused_rnn_classifier_kernel(x_ref, w_ref, o_ref):
    B, T, D = x_ref.shape
    H = w_ref.shape[1]
    C = o_ref.shape[1]
    L = 3
    f32 = jnp.float32
    layout, _ = _pack_layout(D, H)

    def wslice(name):
        off, rows = layout[name]
        return w_ref[off:off + rows, :]

    wih0 = wslice("wih0")   # (D, H)
    whh0 = wslice("whh0")   # (H, H)
    b0 = wslice("b0")       # (1, H)
    w1 = wslice("w1")       # (2H, H) = [Wih1; Whh1]
    b1 = wslice("b1")
    w2 = wslice("w2")       # (2H, H) = [Wih2; Whh2]
    b2 = wslice("b2")
    fcw = wslice("fcw")     # (H, H)  (cols >= C are zero padding)
    fcb = wslice("fcb")     # (1, H)

    # --- layer-0 input projection for ALL timesteps: one batched MXU matmul ----
    x = x_ref[...]                                     # (B, T, D), batch-first
    xproj = (
        jnp.dot(x.reshape(B * T, D), wih0, preferred_element_type=f32) + b0
    ).reshape(B, T, H)
    # Hoisted per-step slices (independent of the recurrence -> off critical path).
    xp_t = [xproj[:, t, :] for t in range(T)]          # each (B, H)

    # --- wavefront (diagonal) schedule over (layer, time) ----------------------
    # At wavefront step s we compute cell (l, t=s-l) for every valid l; all cells
    # of one step depend only on results of step s-1, so they overlap on MXU/EUP.
    h = [jnp.zeros((B, H), f32) for _ in range(L)]     # h^l at its latest time
    for s in range(T + L - 1):
        nh = list(h)
        for l in range(L):
            t = s - l
            if 0 <= t < T:
                if l == 0:
                    pre = xp_t[t] + jnp.dot(h[0], whh0, preferred_element_type=f32)
                else:
                    w_cat = w1 if l == 1 else w2
                    b_cat = b1 if l == 1 else b2
                    inp = jnp.concatenate([h[l - 1], h[l]], axis=1)   # (B, 2H)
                    pre = jnp.dot(inp, w_cat, preferred_element_type=f32) + b_cat
                nh[l] = jnp.tanh(pre)
        h = nh

    # --- fc head on the final hidden state of the last layer -------------------
    logits = jnp.dot(h[L - 1], fcw, preferred_element_type=f32) + fcb   # (B, H)
    o_ref[...] = logits[:, :C]


# ------------------------------- wrapper --------------------------------------
def _pack_params(params, D, H, C):
    """Pack all weights/biases into one (rows, H) f32 buffer (8-row-aligned)."""
    assert C <= H, "fc head columns are padded into the H-wide packed buffer"
    l0, l1, l2 = params["layers"]
    blocks = {
        "wih0": l0["wih"], "whh0": l0["whh"], "b0": l0["b"],
        "w1": jnp.concatenate([l1["wih"], l1["whh"]], axis=0), "b1": l1["b"],
        "w2": jnp.concatenate([l2["wih"], l2["whh"]], axis=0), "b2": l2["b"],
        "fcw": params["fc_w"], "fcb": params["fc_b"],
    }
    layout, _ = _pack_layout(D, H)
    parts = []
    for name in _WEIGHT_ORDER:
        a = blocks[name].astype(jnp.float32)
        _, rows = layout[name]
        parts.append(
            jnp.pad(a, ((0, _round8(rows) - a.shape[0]), (0, H - a.shape[1])))
        )
    return jnp.concatenate(parts, axis=0)


def rnn_classifier_forward(params, x_btd):
    """x_btd: (B, T, input_size)  ->  logits (B, num_classes)."""
    x = x_btd.astype(jnp.float32)
    B, T, D = x.shape
    H = params["layers"][0]["whh"].shape[0]
    C = params["fc_w"].shape[1]

    wpack = _pack_params(params, D, H, C)   # single weights input -> single DMA

    # Advisory cost hint for XLA scheduling around the custom call.
    flops = 2 * T * B * H * (D + H)          # layer 0 (batched xproj + recurrent)
    flops += 2 * 2 * T * B * (2 * H) * H     # layers 1, 2 (fused concat matmuls)
    flops += 2 * B * H * C                   # fc head
    transcendentals = 3 * T * B * H          # tanh
    bytes_accessed = int(x.size) * 4 + int(wpack.size) * 4 + B * C * 4

    return pl.pallas_call(
        fused_rnn_classifier_kernel,
        out_shape=jax.ShapeDtypeStruct((B, C), jnp.float32),
        in_specs=[
            pl.BlockSpec(x.shape, lambda: (0, 0, 0)),
            pl.BlockSpec(wpack.shape, lambda: (0, 0)),
        ],
        out_specs=pl.BlockSpec((B, C), lambda: (0, 0)),
        cost_estimate=pl.CostEstimate(
            flops=flops,
            transcendentals=transcendentals,
            bytes_accessed=bytes_accessed,
        ),
    )(x, wpack)


# ------------------------------- params & ref --------------------------------
def init_params(key, input_size, hidden_size, num_layers, num_classes):
    """Deterministic init mimicking PyTorch's U(-1/sqrt(H), 1/sqrt(H))."""
    params = {"layers": []}
    bound = 1.0 / jnp.sqrt(jnp.float32(hidden_size))
    for l in range(num_layers):
        d_in = input_size if l == 0 else hidden_size
        key, k1, k2, k3, k4 = jax.random.split(key, 5)
        wih = jax.random.uniform(k1, (d_in, hidden_size), jnp.float32, -bound, bound)
        whh = jax.random.uniform(k2, (hidden_size, hidden_size), jnp.float32, -bound, bound)
        bih = jax.random.uniform(k3, (hidden_size,), jnp.float32, -bound, bound)
        bhh = jax.random.uniform(k4, (hidden_size,), jnp.float32, -bound, bound)
        params["layers"].append(
            {"wih": wih, "whh": whh, "b": (bih + bhh).reshape(1, hidden_size)}
        )
    key, k1, k2 = jax.random.split(key, 3)
    params["fc_w"] = jax.random.uniform(
        k1, (hidden_size, num_classes), jnp.float32, -bound, bound
    )
    params["fc_b"] = jax.random.uniform(
        k2, (1, num_classes), jnp.float32, -bound, bound
    )
    return params


def reference_forward(params, x_btd):
    """Pure-JAX reference for correctness checking."""
    B = x_btd.shape[0]
    h_seq = jnp.transpose(x_btd, (1, 0, 2)).astype(jnp.float32)  # (T, B, D)
    for layer in params["layers"]:
        H = layer["whh"].shape[1]

        def step(h_prev, x_t):
            h_new = jnp.tanh(x_t @ layer["wih"] + h_prev @ layer["whh"] + layer["b"])
            return h_new, h_new

        _, h_seq = jax.lax.scan(step, jnp.zeros((B, H), jnp.float32), h_seq)
    return h_seq[-1] @ params["fc_w"] + params["fc_b"]


# ----------------------------------- main -------------------------------------
if __name__ == "__main__":
    input_size = 4
    hidden_size = 32
    num_layers = 3
    num_classes = 2
    batch = 2
    seq = 8

    key = jax.random.PRNGKey(0)
    key, kx, kp = jax.random.split(key, 3)
    x = jax.random.normal(kx, (batch, seq, input_size), dtype=jnp.float32)
    params = init_params(kp, input_size, hidden_size, num_layers, num_classes)

    out = rnn_classifier_forward(params, x)
    out = jax.block_until_ready(out)

    ref = jax.block_until_ready(reference_forward(params, x))
    assert out.shape == (batch, num_classes)
    assert jnp.allclose(out, ref, atol=1e-4, rtol=1e-4)

    print("KERNEL_OK")
</pallas_src>

<mosaic_0001>
module attributes {stable_mosaic.version = 11 : i64} {
  func.func @fused_rnn_classifier_kernel(%arg0: memref<2x8x4xf32, #tpu.memory_space<vmem>>, %arg1: memref<232x32xf32, #tpu.memory_space<vmem>>, %arg2: memref<2x2xf32, #tpu.memory_space<vmem>>) attributes {dimension_semantics = [], scalar_prefetch = 0 : i64, scratch_operands = 0 : i64, tpu.core_type = #tpu.core_type<tc>} {
    %c0 = arith.constant 0 : index
    %c0_0 = arith.constant 0 : index
    %0 = vector.load %arg1[%c0, %c0_0] : memref<232x32xf32, #tpu.memory_space<vmem>>, vector<4x32xf32>
    %c8 = arith.constant 8 : index
    %c0_1 = arith.constant 0 : index
    %1 = vector.load %arg1[%c8, %c0_1] : memref<232x32xf32, #tpu.memory_space<vmem>>, vector<32x32xf32>
    %c40 = arith.constant 40 : index
    %c0_2 = arith.constant 0 : index
    %2 = vector.load %arg1[%c40, %c0_2] : memref<232x32xf32, #tpu.memory_space<vmem>>, vector<1x32xf32>
    %c48 = arith.constant 48 : index
    %c0_3 = arith.constant 0 : index
    %3 = vector.load %arg1[%c48, %c0_3] : memref<232x32xf32, #tpu.memory_space<vmem>>, vector<64x32xf32>
    %c112 = arith.constant 112 : index
    %c0_4 = arith.constant 0 : index
    %4 = vector.load %arg1[%c112, %c0_4] : memref<232x32xf32, #tpu.memory_space<vmem>>, vector<1x32xf32>
    %c120 = arith.constant 120 : index
    %c0_5 = arith.constant 0 : index
    %5 = vector.load %arg1[%c120, %c0_5] : memref<232x32xf32, #tpu.memory_space<vmem>>, vector<64x32xf32>
    %c184 = arith.constant 184 : index
    %c0_6 = arith.constant 0 : index
    %6 = vector.load %arg1[%c184, %c0_6] : memref<232x32xf32, #tpu.memory_space<vmem>>, vector<1x32xf32>
    %c192 = arith.constant 192 : index
    %c0_7 = arith.constant 0 : index
    %7 = vector.load %arg1[%c192, %c0_7] : memref<232x32xf32, #tpu.memory_space<vmem>>, vector<32x32xf32>
    %c224 = arith.constant 224 : index
    %c0_8 = arith.constant 0 : index
    %8 = vector.load %arg1[%c224, %c0_8] : memref<232x32xf32, #tpu.memory_space<vmem>>, vector<1x32xf32>
    %c0_9 = arith.constant 0 : index
    %c0_10 = arith.constant 0 : index
    %c0_11 = arith.constant 0 : index
    %9 = vector.load %arg0[%c0_9, %c0_10, %c0_11] : memref<2x8x4xf32, #tpu.memory_space<vmem>>, vector<2x8x4xf32>
    %10 = vector.shape_cast %9 : vector<2x8x4xf32> to vector<16x4xf32>
    %cst = arith.constant dense<0.000000e+00> : vector<16x32xf32>
    %11 = tpu.matmul %10, %0, %cst {dimension_numbers = #tpu.dot_dimension_numbers<[1], [0], [0], [1], [0, 0, 1, 1], [], []>} : vector<16x4xf32>, vector<4x32xf32>, vector<16x32xf32> -> vector<16x32xf32>
    %12 = vector.broadcast %2 : vector<1x32xf32> to vector<16x32xf32>
    %13 = arith.addf %11, %12 : vector<16x32xf32>
    %14 = vector.shape_cast %13 : vector<16x32xf32> to vector<2x8x32xf32>
    %15 = vector.extract_strided_slice %14 {offsets = [0, 0, 0], sizes = [2, 1, 32], strides = [1, 1, 1]} : vector<2x8x32xf32> to vector<2x1x32xf32>
    %16 = vector.shape_cast %15 : vector<2x1x32xf32> to vector<2x32xf32>
    %17 = vector.extract_strided_slice %14 {offsets = [0, 1, 0], sizes = [2, 1, 32], strides = [1, 1, 1]} : vector<2x8x32xf32> to vector<2x1x32xf32>
    %18 = vector.shape_cast %17 : vector<2x1x32xf32> to vector<2x32xf32>
    %19 = vector.extract_strided_slice %14 {offsets = [0, 2, 0], sizes = [2, 1, 32], strides = [1, 1, 1]} : vector<2x8x32xf32> to vector<2x1x32xf32>
    %20 = vector.shape_cast %19 : vector<2x1x32xf32> to vector<2x32xf32>
    %21 = vector.extract_strided_slice %14 {offsets = [0, 3, 0], sizes = [2, 1, 32], strides = [1, 1, 1]} : vector<2x8x32xf32> to vector<2x1x32xf32>
    %22 = vector.shape_cast %21 : vector<2x1x32xf32> to vector<2x32xf32>
    %23 = vector.extract_strided_slice %14 {offsets = [0, 4, 0], sizes = [2, 1, 32], strides = [1, 1, 1]} : vector<2x8x32xf32> to vector<2x1x32xf32>
    %24 = vector.shape_cast %23 : vector<2x1x32xf32> to vector<2x32xf32>
    %25 = vector.extract_strided_slice %14 {offsets = [0, 5, 0], sizes = [2, 1, 32], strides = [1, 1, 1]} : vector<2x8x32xf32> to vector<2x1x32xf32>
    %26 = vector.shape_cast %25 : vector<2x1x32xf32> to vector<2x32xf32>
    %27 = vector.extract_strided_slice %14 {offsets = [0, 6, 0], sizes = [2, 1, 32], strides = [1, 1, 1]} : vector<2x8x32xf32> to vector<2x1x32xf32>
    %28 = vector.shape_cast %27 : vector<2x1x32xf32> to vector<2x32xf32>
    %29 = vector.extract_strided_slice %14 {offsets = [0, 7, 0], sizes = [2, 1, 32], strides = [1, 1, 1]} : vector<2x8x32xf32> to vector<2x1x32xf32>
    %30 = vector.shape_cast %29 : vector<2x1x32xf32> to vector<2x32xf32>
    %cst_12 = arith.constant 0.000000e+00 : f32
    %31 = vector.broadcast %cst_12 : f32 to vector<2x32xf32>
    %cst_13 = arith.constant 0.000000e+00 : f32
    %32 = vector.broadcast %cst_13 : f32 to vector<2x32xf32>
    %cst_14 = arith.constant 0.000000e+00 : f32
    %33 = vector.broadcast %cst_14 : f32 to vector<2x32xf32>
    %cst_15 = arith.constant dense<0.000000e+00> : vector<2x32xf32>
    %34 = tpu.matmul %31, %1, %cst_15 {dimension_numbers = #tpu.dot_dimension_numbers<[1], [0], [0], [1], [0, 0, 1, 1], [], []>} : vector<2x32xf32>, vector<32x32xf32>, vector<2x32xf32> -> vector<2x32xf32>
    %35 = arith.addf %16, %34 : vector<2x32xf32>
    %36 = math.tanh %35 : vector<2x32xf32>
    %cst_16 = arith.constant dense<0.000000e+00> : vector<2x32xf32>
    %37 = tpu.matmul %36, %1, %cst_16 {dimension_numbers = #tpu.dot_dimension_numbers<[1], [0], [0], [1], [0, 0, 1, 1], [], []>} : vector<2x32xf32>, vector<32x32xf32>, vector<2x32xf32> -> vector<2x32xf32>
    %38 = arith.addf %18, %37 : vector<2x32xf32>
    %39 = math.tanh %38 : vector<2x32xf32>
    %40 = tpu.concatenate %36, %32 in 1 : vector<2x32xf32>, vector<2x32xf32> -> vector<2x64xf32>
    %cst_17 = arith.constant dense<0.000000e+00> : vector<2x32xf32>
    %41 = tpu.matmul %40, %3, %cst_17 {dimension_numbers = #tpu.dot_dimension_numbers<[1], [0], [0], [1], [0, 0, 1, 1], [], []>} : vector<2x64xf32>, vector<64x32xf32>, vector<2x32xf32> -> vector<2x32xf32>
    %42 = vector.broadcast %4 : vector<1x32xf32> to vector<2x32xf32>
    %43 = arith.addf %41, %42 : vector<2x32xf32>
    %44 = math.tanh %43 : vector<2x32xf32>
    %cst_18 = arith.constant dense<0.000000e+00> : vector<2x32xf32>
    %45 = tpu.matmul %39, %1, %cst_18 {dimension_numbers = #tpu.dot_dimension_numbers<[1], [0], [0], [1], [0, 0, 1, 1], [], []>} : vector<2x32xf32>, vector<32x32xf32>, vector<2x32xf32> -> vector<2x32xf32>
    %46 = arith.addf %20, %45 : vector<2x32xf32>
    %47 = math.tanh %46 : vector<2x32xf32>
    %48 = tpu.concatenate %39, %44 in 1 : vector<2x32xf32>, vector<2x32xf32> -> vector<2x64xf32>
    %cst_19 = arith.constant dense<0.000000e+00> : vector<2x32xf32>
    %49 = tpu.matmul %48, %3, %cst_19 {dimension_numbers = #tpu.dot_dimension_numbers<[1], [0], [0], [1], [0, 0, 1, 1], [], []>} : vector<2x64xf32>, vector<64x32xf32>, vector<2x32xf32> -> vector<2x32xf32>
    %50 = vector.broadcast %4 : vector<1x32xf32> to vector<2x32xf32>
    %51 = arith.addf %49, %50 : vector<2x32xf32>
    %52 = math.tanh %51 : vector<2x32xf32>
    %53 = tpu.concatenate %44, %33 in 1 : vector<2x32xf32>, vector<2x32xf32> -> vector<2x64xf32>
    %cst_20 = arith.constant dense<0.000000e+00> : vector<2x32xf32>
    %54 = tpu.matmul %53, %5, %cst_20 {dimension_numbers = #tpu.dot_dimension_numbers<[1], [0], [0], [1], [0, 0, 1, 1], [], []>} : vector<2x64xf32>, vector<64x32xf32>, vector<2x32xf32> -> vector<2x32xf32>
    %55 = vector.broadcast %6 : vector<1x32xf32> to vector<2x32xf32>
    %56 = arith.addf %54, %55 : vector<2x32xf32>
    %57 = math.tanh %56 : vector<2x32xf32>
    %cst_21 = arith.constant dense<0.000000e+00> : vector<2x32xf32>
    %58 = tpu.matmul %47, %1, %cst_21 {dimension_numbers = #tpu.dot_dimension_numbers<[1], [0], [0], [1], [0, 0, 1, 1], [], []>} : vector<2x32xf32>, vector<32x32xf32>, vector<2x32xf32> -> vector<2x32xf32>
    %59 = arith.addf %22, %58 : vector<2x32xf32>
    %60 = math.tanh %59 : vector<2x32xf32>
    %61 = tpu.concatenate %47, %52 in 1 : vector<2x32xf32>, vector<2x32xf32> -> vector<2x64xf32>
    %cst_22 = arith.constant dense<0.000000e+00> : vector<2x32xf32>
    %62 = tpu.matmul %61, %3, %cst_22 {dimension_numbers = #tpu.dot_dimension_numbers<[1], [0], [0], [1], [0, 0, 1, 1], [], []>} : vector<2x64xf32>, vector<64x32xf32>, vector<2x32xf32> -> vector<2x32xf32>
    %63 = vector.broadcast %4 : vector<1x32xf32> to vector<2x32xf32>
    %64 = arith.addf %62, %63 : vector<2x32xf32>
    %65 = math.tanh %64 : vector<2x32xf32>
    %66 = tpu.concatenate %52, %57 in 1 : vector<2x32xf32>, vector<2x32xf32> -> vector<2x64xf32>
    %cst_23 = arith.constant dense<0.000000e+00> : vector<2x32xf32>
    %67 = tpu.matmul %66, %5, %cst_23 {dimension_numbers = #tpu.dot_dimension_numbers<[1], [0], [0], [1], [0, 0, 1, 1], [], []>} : vector<2x64xf32>, vector<64x32xf32>, vector<2x32xf32> -> vector<2x32xf32>
    %68 = vector.broadcast %6 : vector<1x32xf32> to vector<2x32xf32>
    %69 = arith.addf %67, %68 : vector<2x32xf32>
    %70 = math.tanh %69 : vector<2x32xf32>
    %cst_24 = arith.constant dense<0.000000e+00> : vector<2x32xf32>
    %71 = tpu.matmul %60, %1, %cst_24 {dimension_numbers = #tpu.dot_dimension_numbers<[1], [0], [0], [1], [0, 0, 1, 1], [], []>} : vector<2x32xf32>, vector<32x32xf32>, vector<2x32xf32> -> vector<2x32xf32>
    %72 = arith.addf %24, %71 : vector<2x32xf32>
    %73 = math.tanh %72 : vector<2x32xf32>
    %74 = tpu.concatenate %60, %65 in 1 : vector<2x32xf32>, vector<2x32xf32> -> vector<2x64xf32>
    %cst_25 = arith.constant dense<0.000000e+00> : vector<2x32xf32>
    %75 = tpu.matmul %74, %3, %cst_25 {dimension_numbers = #tpu.dot_dimension_numbers<[1], [0], [0], [1], [0, 0, 1, 1], [], []>} : vector<2x64xf32>, vector<64x32xf32>, vector<2x32xf32> -> vector<2x32xf32>
    %76 = vector.broadcast %4 : vector<1x32xf32> to vector<2x32xf32>
    %77 = arith.addf %75, %76 : vector<2x32xf32>
    %78 = math.tanh %77 : vector<2x32xf32>
    %79 = tpu.concatenate %65, %70 in 1 : vector<2x32xf32>, vector<2x32xf32> -> vector<2x64xf32>
    %cst_26 = arith.constant dense<0.000000e+00> : vector<2x32xf32>
    %80 = tpu.matmul %79, %5, %cst_26 {dimension_numbers = #tpu.dot_dimension_numbers<[1], [0], [0], [1], [0, 0, 1, 1], [], []>} : vector<2x64xf32>, vector<64x32xf32>, vector<2x32xf32> -> vector<2x32xf32>
    %81 = vector.broadcast %6 : vector<1x32xf32> to vector<2x32xf32>
    %82 = arith.addf %80, %81 : vector<2x32xf32>
    %83 = math.tanh %82 : vector<2x32xf32>
    %cst_27 = arith.constant dense<0.000000e+00> : vector<2x32xf32>
    %84 = tpu.matmul %73, %1, %cst_27 {dimension_numbers = #tpu.dot_dimension_numbers<[1], [0], [0], [1], [0, 0, 1, 1], [], []>} : vector<2x32xf32>, vector<32x32xf32>, vector<2x32xf32> -> vector<2x32xf32>
    %85 = arith.addf %26, %84 : vector<2x32xf32>
    %86 = math.tanh %85 : vector<2x32xf32>
    %87 = tpu.concatenate %73, %78 in 1 : vector<2x32xf32>, vector<2x32xf32> -> vector<2x64xf32>
    %cst_28 = arith.constant dense<0.000000e+00> : vector<2x32xf32>
    %88 = tpu.matmul %87, %3, %cst_28 {dimension_numbers = #tpu.dot_dimension_numbers<[1], [0], [0], [1], [0, 0, 1, 1], [], []>} : vector<2x64xf32>, vector<64x32xf32>, vector<2x32xf32> -> vector<2x32xf32>
    %89 = vector.broadcast %4 : vector<1x32xf32> to vector<2x32xf32>
    %90 = arith.addf %88, %89 : vector<2x32xf32>
    %91 = math.tanh %90 : vector<2x32xf32>
    %92 = tpu.concatenate %78, %83 in 1 : vector<2x32xf32>, vector<2x32xf32> -> vector<2x64xf32>
    %cst_29 = arith.constant dense<0.000000e+00> : vector<2x32xf32>
    %93 = tpu.matmul %92, %5, %cst_29 {dimension_numbers = #tpu.dot_dimension_numbers<[1], [0], [0], [1], [0, 0, 1, 1], [], []>} : vector<2x64xf32>, vector<64x32xf32>, vector<2x32xf32> -> vector<2x32xf32>
    %94 = vector.broadcast %6 : vector<1x32xf32> to vector<2x32xf32>
    %95 = arith.addf %93, %94 : vector<2x32xf32>
    %96 = math.tanh %95 : vector<2x32xf32>
    %cst_30 = arith.constant dense<0.000000e+00> : vector<2x32xf32>
    %97 = tpu.matmul %86, %1, %cst_30 {dimension_numbers = #tpu.dot_dimension_numbers<[1], [0], [0], [1], [0, 0, 1, 1], [], []>} : vector<2x32xf32>, vector<32x32xf32>, vector<2x32xf32> -> vector<2x32xf32>
    %98 = arith.addf %28, %97 : vector<2x32xf32>
    %99 = math.tanh %98 : vector<2x32xf32>
    %100 = tpu.concatenate %86, %91 in 1 : vector<2x32xf32>, vector<2x32xf32> -> vector<2x64xf32>
    %cst_31 = arith.constant dense<0.000000e+00> : vector<2x32xf32>
    %101 = tpu.matmul %100, %3, %cst_31 {dimension_numbers = #tpu.dot_dimension_numbers<[1], [0], [0], [1], [0, 0, 1, 1], [], []>} : vector<2x64xf32>, vector<64x32xf32>, vector<2x32xf32> -> vector<2x32xf32>
    %102 = vector.broadcast %4 : vector<1x32xf32> to vector<2x32xf32>
    %103 = arith.addf %101, %102 : vector<2x32xf32>
    %104 = math.tanh %103 : vector<2x32xf32>
    %105 = tpu.concatenate %91, %96 in 1 : vector<2x32xf32>, vector<2x32xf32> -> vector<2x64xf32>
    %cst_32 = arith.constant dense<0.000000e+00> : vector<2x32xf32>
    %106 = tpu.matmul %105, %5, %cst_32 {dimension_numbers = #tpu.dot_dimension_numbers<[1], [0], [0], [1], [0, 0, 1, 1], [], []>} : vector<2x64xf32>, vector<64x32xf32>, vector<2x32xf32> -> vector<2x32xf32>
    %107 = vector.broadcast %6 : vector<1x32xf32> to vector<2x32xf32>
    %108 = arith.addf %106, %107 : vector<2x32xf32>
    %109 = math.tanh %108 : vector<2x32xf32>
    %cst_33 = arith.constant dense<0.000000e+00> : vector<2x32xf32>
    %110 = tpu.matmul %99, %1, %cst_33 {dimension_numbers = #tpu.dot_dimension_numbers<[1], [0], [0], [1], [0, 0, 1, 1], [], []>} : vector<2x32xf32>, vector<32x32xf32>, vector<2x32xf32> -> vector<2x32xf32>
    %111 = arith.addf %30, %110 : vector<2x32xf32>
    %112 = math.tanh %111 : vector<2x32xf32>
    %113 = tpu.concatenate %99, %104 in 1 : vector<2x32xf32>, vector<2x32xf32> -> vector<2x64xf32>
    %cst_34 = arith.constant dense<0.000000e+00> : vector<2x32xf32>
    %114 = tpu.matmul %113, %3, %cst_34 {dimension_numbers = #tpu.dot_dimension_numbers<[1], [0], [0], [1], [0, 0, 1, 1], [], []>} : vector<2x64xf32>, vector<64x32xf32>, vector<2x32xf32> -> vector<2x32xf32>
    %115 = vector.broadcast %4 : vector<1x32xf32> to vector<2x32xf32>
    %116 = arith.addf %114, %115 : vector<2x32xf32>
    %117 = math.tanh %116 : vector<2x32xf32>
    %118 = tpu.concatenate %104, %109 in 1 : vector<2x32xf32>, vector<2x32xf32> -> vector<2x64xf32>
    %cst_35 = arith.constant dense<0.000000e+00> : vector<2x32xf32>
    %119 = tpu.matmul %118, %5, %cst_35 {dimension_numbers = #tpu.dot_dimension_numbers<[1], [0], [0], [1], [0, 0, 1, 1], [], []>} : vector<2x64xf32>, vector<64x32xf32>, vector<2x32xf32> -> vector<2x32xf32>
    %120 = vector.broadcast %6 : vector<1x32xf32> to vector<2x32xf32>
    %121 = arith.addf %119, %120 : vector<2x32xf32>
    %122 = math.tanh %121 : vector<2x32xf32>
    %123 = tpu.concatenate %112, %117 in 1 : vector<2x32xf32>, vector<2x32xf32> -> vector<2x64xf32>
    %cst_36 = arith.constant dense<0.000000e+00> : vector<2x32xf32>
    %124 = tpu.matmul %123, %3, %cst_36 {dimension_numbers = #tpu.dot_dimension_numbers<[1], [0], [0], [1], [0, 0, 1, 1], [], []>} : vector<2x64xf32>, vector<64x32xf32>, vector<2x32xf32> -> vector<2x32xf32>
    %125 = vector.broadcast %4 : vector<1x32xf32> to vector<2x32xf32>
    %126 = arith.addf %124, %125 : vector<2x32xf32>
    %127 = math.tanh %126 : vector<2x32xf32>
    %128 = tpu.concatenate %117, %122 in 1 : vector<2x32xf32>, vector<2x32xf32> -> vector<2x64xf32>
    %cst_37 = arith.constant dense<0.000000e+00> : vector<2x32xf32>
    %129 = tpu.matmul %128, %5, %cst_37 {dimension_numbers = #tpu.dot_dimension_numbers<[1], [0], [0], [1], [0, 0, 1, 1], [], []>} : vector<2x64xf32>, vector<64x32xf32>, vector<2x32xf32> -> vector<2x32xf32>
    %130 = vector.broadcast %6 : vector<1x32xf32> to vector<2x32xf32>
    %131 = arith.addf %129, %130 : vector<2x32xf32>
    %132 = math.tanh %131 : vector<2x32xf32>
    %133 = tpu.concatenate %127, %132 in 1 : vector<2x32xf32>, vector<2x32xf32> -> vector<2x64xf32>
    %cst_38 = arith.constant dense<0.000000e+00> : vector<2x32xf32>
    %134 = tpu.matmul %133, %5, %cst_38 {dimension_numbers = #tpu.dot_dimension_numbers<[1], [0], [0], [1], [0, 0, 1, 1], [], []>} : vector<2x64xf32>, vector<64x32xf32>, vector<2x32xf32> -> vector<2x32xf32>
    %135 = vector.broadcast %6 : vector<1x32xf32> to vector<2x32xf32>
    %136 = arith.addf %134, %135 : vector<2x32xf32>
    %137 = math.tanh %136 : vector<2x32xf32>
    %cst_39 = arith.constant dense<0.000000e+00> : vector<2x32xf32>
    %138 = tpu.matmul %137, %7, %cst_39 {dimension_numbers = #tpu.dot_dimension_numbers<[1], [0], [0], [1], [0, 0, 1, 1], [], []>} : vector<2x32xf32>, vector<32x32xf32>, vector<2x32xf32> -> vector<2x32xf32>
    %139 = vector.broadcast %8 : vector<1x32xf32> to vector<2x32xf32>
    %140 = arith.addf %138, %139 : vector<2x32xf32>
    %141 = vector.extract_strided_slice %140 {offsets = [0, 0], sizes = [2, 2], strides = [1, 1]} : vector<2x32xf32> to vector<2x2xf32>
    %c0_40 = arith.constant 0 : index
    %c0_41 = arith.constant 0 : index
    %142 = vector.load %arg2[%c0_40, %c0_41] : memref<2x2xf32, #tpu.memory_space<vmem>>, vector<2x2xf32>
    tpu.vector_store %arg2[%c0_40, %c0_41], %141 {strides = array<i32>} : memref<2x2xf32, #tpu.memory_space<vmem>>, vector<2x2xf32>,
    return
  }
}

</mosaic_0001>

<bundles_post_ra>
// kernel: tpu_custom_call.1
= control target key start
LH: loop header
LB: loop body
LE: loop exit
PB: predicated region body
PF: predicated region fallthrough
CT: control target
= control target key end

     0   :  { %vm54_vm0 = vcmask 1043456   ;;  %v2961_v3 = vmov 0.0   ;;  %vm47_vm1 = vcmask 31744   ;;  %s3645_s0 = inlined_call_operand.vmem [shape: f32[2,8,4], index: 0, kind: input, shape index: {}]   ;;  %s3646_s1 = inlined_call_operand.vmem [shape: f32[232,32], index: 1, kind: input, shape index: {}]   ;;  %s3647_s2 = inlined_call_operand.hbm [shape: f32[2,2], index: 2, kind: output, shape index: {}]  }
   0x1   :  { %v2983_v0 = vld [vmem:[%s3646_s1 + $0x20] sm:$0xff]  ;;  %2450 = vmatprep.subr.mxu1 %v2961_v3  ;;  %v2995_v4 = vld [vmem:[%s3646_s1 + $0x18] sm:$0xff]  ;;  %v42_v5 = vld [vmem:[%s3645_s0 + $0x8] sm:$0xff] }
   0x2   :  { %v12_v1 = vld [vmem:[%s3646_s1] sm:$0xf]  ;;  %2451 = vmatpush3.msra.mxu1 %v2983_v0 }
   0x3   :  { %v41_v2 = vld [vmem:[%s3645_s0] sm:$0xff]  ;;  %2445 = vmatprep.subr.msk.mxu0 %vm54_vm0, %v12_v1 }
   0x4   :  { %2446 = vmatpush3.msk.msra.mxu0 %vm54_vm0, %v12_v1 }
   0x5   :  { %7 = vsyncpa [#allocation3], 0  ;;  %2452 = vmatprep.subr.mxu1 %v2961_v3  ;;  %2447 = vmatprep.mubr.msk.f32.mxu0 %vm47_vm1, %v41_v2  ;;  %v3005_v6 = vld [vmem:[%s3646_s1 + $0x10] sm:$0xff]  ;;  %v3012_v7 = vld [vmem:[%s3646_s1 + $0x8] sm:$0xff]  ;;  %vm2962_vm2 = vmmov 0   ;;  %vm218_vm3 = vcmask 1041409  }
   0x6   :  { %2453 = vmatpush3.msra.mxu1 %v2995_v4  ;;  %2448 = vmatmul.mubr.msk.f32.vlgmr.msra.gmra.mxu0 %vm47_vm1, %v42_v5  ;;  %v3037_v8 = vld [vmem:[%s3646_s1 + $0x68] sm:$0xff]  ;;  %v3044_v9 = vld [vmem:[%s3646_s1 + $0x60] sm:$0xff]  ;;  %v3051_v10 = vld [vmem:[%s3646_s1 + $0x58] sm:$0xff]  ;;  %vm133_vm4 = vcmask 261120   ;;  %vm306_vm5 = vcmask 523264   ;;  %vm467_vm6 = vcmask 1042434  }
   0x7   :  { %2454 = vmatprep.subr.mxu1 %v2961_v3  ;;  %2458 = vmatprep.mubr.msk.f32.mxu1 %vm2962_vm2, %v2961_v3  ;;  %v3058_v11 = vld [vmem:[%s3646_s1 + $0x50] sm:$0xff]  ;;  %v3065_v12 = vld [vmem:[%s3646_s1 + $0x48] sm:$0xff]  ;;  %v3072_v13 = vld [vmem:[%s3646_s1 + $0x40] sm:$0xff]  ;;  %s2963_s29 = smov 32   ;;  %vm717_vm7 = vcmask 1043459   ;;  %vm967_vm8 = vcmask 1044484  }
   0x8   :  { %2455 = vmatpush3.msra.mxu1 %v3005_v6  ;;  %2461 = vmatprep.subr.mxu0 %v2961_v3  ;;  %v3079_v14 = vld [vmem:[%s3646_s1 + $0x38] sm:$0xff]  ;;  %v3086_v15 = vld [vmem:[%s3646_s1 + $0x30] sm:$0xff]  ;;  %v2222_v17 = vld [vmem:[%s3646_s1 + $0x28] ss:$0 sm:$0xff]  ;;  %vm1217_vm9 = vcmask 1045509   ;;  %vm1467_vm10 = vcmask 1046534  }
   0x9   :  { %2456 = vmatprep.subr.mxu1 %v2961_v3  ;;  %2462 = vmatpush3.msra.mxu0 %v2983_v0  ;;  %v3118_v31 = vld [vmem:[%s3646_s1 + $0xb0] sm:$0xff]  ;;  %v3125_v32 = vld [vmem:[%s3646_s1 + $0xa8] sm:$0xff]  ;;  %v3130_v33 = vld [vmem:[%s3646_s1 + $0xa0] sm:$0xff]  ;;  %vm1717_vm11 = vcmask 1047559   ;;  %vm1894_vm12 = vcmask 1040384   ;;  %s2964_s21 = smov [#allocation2]  }
   0xa   :  { %2457 = vmatpush3.msra.mxu1 %v3012_v7  ;;  %2463 = vmatprep.subr.mxu0 %v2961_v3  ;;  %v3137_v34 = vld [vmem:[%s3646_s1 + $0x98] sm:$0xff]  ;;  %v3144_v35 = vld [vmem:[%s3646_s1 + $0x90] sm:$0xff]  ;;  %v3151_v36 = vld [vmem:[%s3646_s1 + $0x88] sm:$0xff]  ;;  %s2214_s22 = sshll.u32 %s2964_s21, 4  ;;  %vm2206_vm13 = vcmask 9216   ;;  %s2215_s22 = int_to_ptr.vmem [resolvable:$true] %s2214_s22 }
   0xb   :  { %2459 = vmatmul.mubr.f32.vlgmr.msra.gmra.mxu1 %v2961_v3  ;;  %2472 = vmatprep.subr.mxu1 %v2961_v3  ;;  %v3158_v37 = vld [vmem:[%s3646_s1 + $0x80] sm:$0xff]  ;;  %v3165_v38 = vld [vmem:[%s3646_s1 + $0x78] sm:$0xff]  ;;  %v3174_v39 = vld [vmem:[%s3646_s1 + $0x70] ss:$0 sm:$0xff]  ;;  %s2939_s0 = scalar_lea.vmem %s2215_s22, 32  ;;  %p2944_p1 = scmp.lt.s32.totalorder %s2215_s22, %s2215_s22 }
   0xc   :  { %2464 = vmatpush3.msra.mxu0 %v2995_v4  ;;  %2469 = vmatprep.mubr.msk.f32.mxu0 %vm2962_vm2, %v2961_v3  ;;  %v3235_v60 = vld [vmem:[%s3646_s1 + $0xb8] ss:$0 sm:$0xff]  ;;  %p2940_p0 = scmp.ne.s32.totalorder %s2215_s22, %s2939_s0  ;;  %p2945_p2 = scmp.lt.s32.totalorder %s2939_s0, %s2939_s0 }
   0xd   :  { %2465 = vmatprep.subr.mxu0 %v2961_v3  ;;  %2488 = vmatprep.mubr.msk.f32.mxu1 %vm2962_vm2, %v2961_v3 }
   0xe   :  { %2466 = vmatpush3.msra.mxu0 %v3005_v6  ;;  %2473 = vmatpush3.msra.mxu1 %v3037_v8  ;;  %p2946_p3 = por %p2945_p2, %p2944_p1 }
   0xf   :  { %2467 = vmatprep.subr.mxu0 %v2961_v3  ;;  %2474 = vmatprep.subr.mxu1 %v2961_v3 }
  0x10   :  { %2468 = vmatpush3.msra.mxu0 %v3012_v7  ;;  %2475 = vmatpush3.msra.mxu1 %v3044_v9  ;;  %p2947_p4 = pnand %p2946_p3, %p2940_p0 }
  0x11   :  { %2491 = vmatprep.subr.mxu0 %v2961_v3  ;;  %2476 = vmatprep.subr.mxu1 %v2961_v3 }
  0x12   :  { %2477 = vmatpush3.msra.mxu1 %v3051_v10 }
  0x13   :  { %2478 = vmatprep.subr.mxu1 %v2961_v3 }
  0x14   :  { %2479 = vmatpush3.msra.mxu1 %v3058_v11 }
  0x15   :  { %2480 = vmatprep.subr.mxu1 %v2961_v3 }
  0x16   :  { %2481 = vmatpush3.msra.mxu1 %v3065_v12 }
  0x17   :  { %2482 = vmatprep.subr.mxu1 %v2961_v3 }
  0x18   :  { %2483 = vmatpush3.msra.mxu1 %v3072_v13 }
  0x19   :  { %2484 = vmatprep.subr.mxu1 %v2961_v3 }
  0x1a   :  { %2485 = vmatpush3.msra.mxu1 %v3079_v14 }
  0x1b   :  { %2486 = vmatprep.subr.mxu1 %v2961_v3 }
  0x1c   :  { %2487 = vmatpush3.msra.mxu1 %v3086_v15 }
  0x1d   :  { %2521 = vmatprep.subr.mxu1 %v2961_v3 }
  0xc6   :  { %v2449_v16 = vpop.f32.mrf.mxu0 }
  0xc7   :  { %v3093_v19 = vadd.f32 %v2449_v16, %v2222_v17 }
  0xc8   :  { %v124_v18 = vpop.f32.mrf.mxu0 }
  0xc9   :  { %v3095_v20 = vadd.f32 %v2222_v17, %v124_v18 }
  0xcb   :  { %v203_v21 = vpop.f32.mrf.mxu1 }
  0xcc   :  { %v208_v22 = vrot.slane %v203_v21, 1  ;;  %v211_v24 = vadd.f32 %v203_v21, %v3095_v20 }
  0xcd   :  { %v2460_v23 = vpop.f32.mrf.mxu1 }
  0xce   :  { %v212_v25 = vadd.f32 %v208_v22, %v3093_v19 }
  0xd0   :  { %2857 = vtanh.f32 %v212_v25 }
  0xd1   :  { %2859 = vtanh.f32 %v211_v24 }
  0xdd   :  { %v2858_v26 = vpop.eup %2857 }
  0xde   :  { %v217_v27 = vrot.slane %v2858_v26, 7  ;;  %v2860_v28 = vpop.eup %2859 }
  0xe0   :  { %v219_v29 = vsel %vm218_vm3, %v217_v27, %v2860_v28 }
  0xe1   :  { %2470 = vmatmul.mubr.msk.f32.vlgmr.msra.gmra.mxu0 %vm133_vm4, %v219_v29  ;;  %v301_v30 = vsel %vm133_vm4, %v219_v29, 0.0 }
  0xe2   :  { %2489 = vmatmul.mubr.msk.f32.vlgmr.msra.gmra.mxu1 %vm306_vm5, %v301_v30  ;;  %2492 = vmatpush3.msra.mxu0 %v2983_v0 }
  0xe3   :  { %2493 = vmatprep.subr.mxu0 %v2961_v3  ;;  %2537 = vmatprep.mubr.msk.f32.mxu1 %vm2962_vm2, %v2961_v3 }
  0xe4   :  { %2494 = vmatpush3.msra.mxu0 %v2995_v4  ;;  %2499 = vmatprep.mubr.msk.f32.mxu0 %vm2962_vm2, %v2961_v3 }
  0xe5   :  { %2495 = vmatprep.subr.mxu0 %v2961_v3  ;;  %2522 = vmatpush3.msra.mxu1 %v3118_v31 }
  0xe6   :  { %2496 = vmatpush3.msra.mxu0 %v3005_v6  ;;  %2523 = vmatprep.subr.mxu1 %v2961_v3 }
  0xe7   :  { %2497 = vmatprep.subr.mxu0 %v2961_v3  ;;  %2524 = vmatpush3.msra.mxu1 %v3125_v32 }
  0xe8   :  { %2498 = vmatpush3.msra.mxu0 %v3012_v7  ;;  %2525 = vmatprep.subr.mxu1 %v2961_v3 }
  0xe9   :  { %2502 = vmatprep.subr.mxu0 %v2961_v3  ;;  %2526 = vmatpush3.msra.mxu1 %v3130_v33 }
  0xea   :  { %2527 = vmatprep.subr.mxu1 %v2961_v3 }
  0xeb   :  { %2528 = vmatpush3.msra.mxu1 %v3137_v34 }
  0xec   :  { %2529 = vmatprep.subr.mxu1 %v2961_v3 }
  0xed   :  { %2530 = vmatpush3.msra.mxu1 %v3144_v35 }
  0xee   :  { %2531 = vmatprep.subr.mxu1 %v2961_v3 }
  0xef   :  { %2532 = vmatpush3.msra.mxu1 %v3151_v36 }
  0xf0   :  { %2533 = vmatprep.subr.mxu1 %v2961_v3 }
  0xf1   :  { %2534 = vmatpush3.msra.mxu1 %v3158_v37 }
  0xf2   :  { %2535 = vmatprep.subr.mxu1 %v2961_v3 }
  0xf3   :  { %2536 = vmatpush3.msra.mxu1 %v3165_v38 }
  0xf4   :  { %2551 = vmatprep.subr.mxu1 %v2961_v3 }
 0x1a1   :  { %v288_v40 = vpop.f32.mrf.mxu0 }
 0x1a2   :  { %v293_v41 = vrot.slane %v288_v40, 7  ;;  %v297_v42 = vadd.f32 %v288_v40, %v3093_v19  ;;  %v376_v43 = vpop.f32.mrf.mxu1 }
 0x1a3   :  { %v377_v44 = vadd.f32 %v3174_v39, %v376_v43  ;;  %v2471_v45 = vpop.f32.mrf.mxu0 }
 0x1a4   :  { %v296_v46 = vadd.f32 %v293_v41, %v3095_v20  ;;  %2861 = vtanh.f32 %v297_v42  ;;  %v2490_v47 = vpop.f32.mrf.mxu1 }
 0x1a5   :  { %2863 = vtanh.f32 %v377_v44 }
 0x1a6   :  { %2865 = vtanh.f32 %v296_v46 }
 0x1b1   :  { %v2862_v48 = vpop.eup %2861 }
 0x1b2   :  { %v2864_v49 = vpop.eup %2863  ;;  %v466_v50 = vrot.slane %v2862_v48, 7 }
 0x1b3   :  { %v2866_v51 = vpop.eup %2865  ;;  %v551_v52 = vsel %vm133_vm4, %v2864_v49, 0.0  ;;  %v471_v53 = vrot.slane %v2864_v49, 7 }
 0x1b4   :  { %2538 = vmatmul.mubr.msk.f32.vlgmr.msra.gmra.mxu1 %vm306_vm5, %v551_v52  ;;  %v383_v54 = vrot.slane %v2866_v51, 1  ;;  %v468_v55 = vsel %vm467_vm6, %v466_v50, %v2866_v51 }
 0x1b5   :  { %472 = vrot.lane.b32.xlu0 %v471_v53, %s2963_s29  ;;  %2552 = vmatpush3.msra.mxu1 %v3037_v8 }
 0x1b6   :  { %v384_v56 = vsel %vm218_vm3, %v2862_v48, %v383_v54  ;;  %2553 = vmatprep.subr.mxu1 %v2961_v3  ;;  %2567 = vmatprep.mubr.msk.f32.mxu1 %vm2962_vm2, %v2961_v3 }
 0x1b7   :  { %2500 = vmatmul.mubr.msk.f32.vlgmr.msra.gmra.mxu0 %vm133_vm4, %v384_v56  ;;  %2554 = vmatpush3.msra.mxu1 %v3044_v9 }
 0x1b8   :  { %2503 = vmatpush3.msra.mxu0 %v3037_v8  ;;  %2518 = vmatprep.mubr.msk.f32.mxu0 %vm2962_vm2, %v2961_v3 }
 0x1b9   :  { %2504 = vmatprep.subr.mxu0 %v2961_v3  ;;  %2555 = vmatprep.subr.mxu1 %v2961_v3 }
 0x1ba   :  { %2505 = vmatpush3.msra.mxu0 %v3044_v9  ;;  %2556 = vmatpush3.msra.mxu1 %v3051_v10 }
 0x1bb   :  { %2506 = vmatprep.subr.mxu0 %v2961_v3  ;;  %2557 = vmatprep.subr.mxu1 %v2961_v3 }
 0x1bc   :  { %2507 = vmatpush3.msra.mxu0 %v3051_v10  ;;  %2558 = vmatpush3.msra.mxu1 %v3058_v11 }
 0x1bd   :  { %2508 = vmatprep.subr.mxu0 %v2961_v3  ;;  %2559 = vmatprep.subr.mxu1 %v2961_v3 }
 0x1be   :  { %2509 = vmatpush3.msra.mxu0 %v3058_v11  ;;  %2560 = vmatpush3.msra.mxu1 %v3065_v12 }
 0x1bf   :  { %2510 = vmatprep.subr.mxu0 %v2961_v3  ;;  %2561 = vmatprep.subr.mxu1 %v2961_v3 }
 0x1c0   :  { %2511 = vmatpush3.msra.mxu0 %v3065_v12  ;;  %2562 = vmatpush3.msra.mxu1 %v3072_v13 }
 0x1c1   :  { %2512 = vmatprep.subr.mxu0 %v2961_v3  ;;  %2563 = vmatprep.subr.mxu1 %v2961_v3 }
 0x1c2   :  { %2513 = vmatpush3.msra.mxu0 %v3072_v13  ;;  %2564 = vmatpush3.msra.mxu1 %v3079_v14 }
 0x1c3   :  { %2514 = vmatprep.subr.mxu0 %v2961_v3  ;;  %2565 = vmatprep.subr.mxu1 %v2961_v3 }
 0x1c4   :  { %2515 = vmatpush3.msra.mxu0 %v3079_v14  ;;  %2566 = vmatpush3.msra.mxu1 %v3086_v15 }
 0x1c5   :  { %2516 = vmatprep.subr.mxu0 %v2961_v3  ;;  %2589 = vmatprep.subr.mxu1 %v2961_v3 }
 0x1c6   :  { %2517 = vmatpush3.msra.mxu0 %v3086_v15 }
 0x1c7   :  { %2540 = vmatprep.subr.mxu0 %v2961_v3 }
 0x227   :  { %v473_v57 = vpop.permute.xlu0 %472 }
 0x228   :  { %v475_v58 = vsel %vm133_vm4, %v468_v55, %v473_v57 }
 0x229   :  { %v477_v59 = vrot.slane %v475_v58, 1 }
 0x22b   :  { %2519 = vmatmul.mubr.msk.f32.vlgmr.msra.gmra.mxu0 %vm306_vm5, %v477_v59 }
 0x22c   :  { %2541 = vmatpush3.msra.mxu0 %v2983_v0  ;;  %2548 = vmatprep.mubr.msk.f32.mxu0 %vm2962_vm2, %v2961_v3 }
 0x22d   :  { %2542 = vmatprep.subr.mxu0 %v2961_v3 }
 0x22e   :  { %2543 = vmatpush3.msra.mxu0 %v2995_v4 }
 0x22f   :  { %2544 = vmatprep.subr.mxu0 %v2961_v3 }
 0x230   :  { %2545 = vmatpush3.msra.mxu0 %v3005_v6 }
 0x231   :  { %2546 = vmatprep.subr.mxu0 %v2961_v3 }
 0x232   :  { %2547 = vmatpush3.msra.mxu0 %v3012_v7 }
 0x233   :  { %2570 = vmatprep.subr.mxu0 %v2961_v3 }
 0x274   :  { %v625_v61 = vpop.f32.mrf.mxu1 }
 0x275   :  { %v626_v62 = vadd.f32 %v3235_v60, %v625_v61 }
 0x276   :  { %v2539_v63 = vpop.f32.mrf.mxu1 }
 0x277   :  { %2867 = vtanh.f32 %v626_v62  ;;  %v453_v1 = vpop.f32.mrf.mxu0 }
 0x278   :  { %v458_v2 = vrot.slane %v453_v1, 6  ;;  %v459_v5 = vrot.slane %v453_v1, 7 }
 0x279   :  { %v2501_v16 = vpop.f32.mrf.mxu0 }
 0x27a   :  { %v462_v17 = vadd.f32 %v458_v2, %v3095_v20  ;;  %v463_v18 = vadd.f32 %v459_v5, %v3093_v19 }
 0x27c   :  { %2869 = vtanh.f32 %v462_v17 }
 0x27d   :  { %2871 = vtanh.f32 %v463_v18 }
 0x284   :  { %v2868_v21 = vpop.eup %2867 }
 0x285   :  { %802 = vrot.lane.b32.xlu0 %v2868_v21, %s2963_s29 }
 0x289   :  { %v2870_v22 = vpop.eup %2869 }
 0x28a   :  { %v2872_v23 = vpop.eup %2871  ;;  %v632_v24 = vrot.slane %v2870_v22, 2 }
 0x28b   :  { %v633_v25 = vrot.slane %v2872_v23, 1  ;;  %v716_v26 = vrot.slane %v2872_v23, 7 }
 0x28d   :  { %v634_v27 = vsel %vm218_vm3, %v633_v25, %v632_v24  ;;  %v718_v28 = vsel %vm717_vm7, %v716_v26, %v2870_v22 }
 0x28e   :  { %2549 = vmatmul.mubr.msk.f32.vlgmr.msra.gmra.mxu0 %vm133_vm4, %v634_v27 }
 0x28f   :  { %2571 = vmatpush3.msra.mxu0 %v3118_v31  ;;  %2586 = vmatprep.mubr.msk.f32.mxu0 %vm2962_vm2, %v2961_v3 }
 0x290   :  { %2572 = vmatprep.subr.mxu0 %v2961_v3 }
 0x291   :  { %2573 = vmatpush3.msra.mxu0 %v3125_v32 }
 0x292   :  { %2574 = vmatprep.subr.mxu0 %v2961_v3 }
 0x293   :  { %2575 = vmatpush3.msra.mxu0 %v3130_v33 }
 0x294   :  { %2576 = vmatprep.subr.mxu0 %v2961_v3 }
 0x295   :  { %2577 = vmatpush3.msra.mxu0 %v3137_v34 }
 0x296   :  { %2578 = vmatprep.subr.mxu0 %v2961_v3 }
 0x297   :  { %2579 = vmatpush3.msra.mxu0 %v3144_v35 }
 0x298   :  { %2580 = vmatprep.subr.mxu0 %v2961_v3 }
 0x299   :  { %2581 = vmatpush3.msra.mxu0 %v3151_v36 }
 0x29a   :  { %2582 = vmatprep.subr.mxu0 %v2961_v3 }
 0x29b   :  { %2583 = vmatpush3.msra.mxu0 %v3158_v37 }
 0x29c   :  { %2584 = vmatprep.subr.mxu0 %v2961_v3 }
 0x29d   :  { %2585 = vmatpush3.msra.mxu0 %v3165_v38 }
 0x29e   :  { %2600 = vmatprep.subr.mxu0 %v2961_v3 }
 0x2eb   :  { %v546_v29 = vpop.f32.mrf.mxu0 }
 0x2ec   :  { %v547_v30 = vadd.f32 %v3174_v39, %v546_v29 }
 0x2ed   :  { %v2520_v40 = vpop.f32.mrf.mxu0 }
 0x2ee   :  { %2873 = vtanh.f32 %v547_v30 }
 0x2f7   :  { %v803_v42 = vpop.permute.xlu0 %802 }
 0x2fb   :  { %v2874_v41 = vpop.eup %2873 }
 0x2fc   :  { %v805_v43 = vsel %vm133_vm4, %v2874_v41, %v803_v42  ;;  %v721_v44 = vrot.slane %v2874_v41, 6 }
 0x2fd   :  { %2587 = vmatmul.mubr.msk.f32.vlgmr.msra.gmra.mxu0 %vm306_vm5, %v805_v43 }
 0x2fe   :  { %722 = vrot.lane.b32.xlu1 %v721_v44, %s2963_s29  ;;  %2601 = vmatpush3.msra.mxu0 %v3037_v8 }
 0x2ff   :  { %2602 = vmatprep.subr.mxu0 %v2961_v3  ;;  %2616 = vmatprep.mubr.msk.f32.mxu0 %vm2962_vm2, %v2961_v3 }
 0x300   :  { %2603 = vmatpush3.msra.mxu0 %v3044_v9 }
 0x301   :  { %2604 = vmatprep.subr.mxu0 %v2961_v3 }
 0x302   :  { %2605 = vmatpush3.msra.mxu0 %v3051_v10 }
 0x303   :  { %2606 = vmatprep.subr.mxu0 %v2961_v3 }
 0x304   :  { %2607 = vmatpush3.msra.mxu0 %v3058_v11 }
 0x305   :  { %2608 = vmatprep.subr.mxu0 %v2961_v3 }
 0x306   :  { %2609 = vmatpush3.msra.mxu0 %v3065_v12 }
 0x307   :  { %2610 = vmatprep.subr.mxu0 %v2961_v3 }
 0x308   :  { %2611 = vmatpush3.msra.mxu0 %v3072_v13 }
 0x309   :  { %2612 = vmatprep.subr.mxu0 %v2961_v3 }
 0x30a   :  { %2613 = vmatpush3.msra.mxu0 %v3079_v14 }
 0x30b   :  { %2614 = vmatprep.subr.mxu0 %v2961_v3 }
 0x30c   :  { %2615 = vmatpush3.msra.mxu0 %v3086_v15 }
 0x30d   :  { %2638 = vmatprep.subr.mxu0 %v2961_v3 }
 0x34e   :  { %v703_v45 = vpop.f32.mrf.mxu0 }
 0x34f   :  { %v708_v46 = vrot.slane %v703_v45, 5  ;;  %v709_v47 = vrot.slane %v703_v45, 6 }
 0x350   :  { %v2550_v48 = vpop.f32.mrf.mxu0 }
 0x351   :  { %v713_v49 = vadd.f32 %v709_v47, %v3093_v19  ;;  %v712_v50 = vadd.f32 %v708_v46, %v3095_v20 }
 0x353   :  { %2875 = vtanh.f32 %v713_v49 }
 0x354   :  { %2877 = vtanh.f32 %v712_v50 }
 0x360   :  { %v2876_v51 = vpop.eup %2875 }
 0x361   :  { %v966_v52 = vrot.slane %v2876_v51, 7  ;;  %v2878_v53 = vpop.eup %2877  ;;  %v883_v59 = vrot.slane %v2876_v51, 2 }
 0x362   :  { %v882_v58 = vrot.slane %v2878_v53, 3 }
 0x363   :  { %v3285_v54 = vsel %vm967_vm8, %v966_v52, %v2878_v53 }
 0x364   :  { %v884_v61 = vsel %vm218_vm3, %v883_v59, %v882_v58 }
 0x370   :  { %v723_v55 = vpop.permute.xlu1 %722 }
 0x371   :  { %v725_v56 = vsel %vm133_vm4, %v718_v28, %v723_v55 }
 0x372   :  { %v727_v57 = vrot.slane %v725_v56, 2 }
 0x374   :  { %2568 = vmatmul.mubr.msk.f32.vlgmr.msra.gmra.mxu1 %vm306_vm5, %v727_v57 }
 0x375   :  { %2590 = vmatpush3.msra.mxu1 %v2983_v0  ;;  %2597 = vmatprep.mubr.msk.f32.mxu1 %vm2962_vm2, %v2961_v3 }
 0x376   :  { %2591 = vmatprep.subr.mxu1 %v2961_v3 }
 0x377   :  { %2592 = vmatpush3.msra.mxu1 %v2995_v4 }
 0x378   :  { %2593 = vmatprep.subr.mxu1 %v2961_v3 }
 0x379   :  { %2594 = vmatpush3.msra.mxu1 %v3005_v6 }
 0x37a   :  { %2595 = vmatprep.subr.mxu1 %v2961_v3 }
 0x37b   :  { %2596 = vmatpush3.msra.mxu1 %v3012_v7 }
 0x37c   :  { %2598 = vmatmul.mubr.msk.f32.vlgmr.msra.gmra.mxu1 %vm133_vm4, %v884_v61  ;;  %2619 = vmatprep.subr.mxu1 %v2961_v3 }
 0x37d   :  { %2620 = vmatpush3.msra.mxu1 %v3118_v31  ;;  %2635 = vmatprep.mubr.msk.f32.mxu1 %vm2962_vm2, %v2961_v3 }
 0x37e   :  { %2621 = vmatprep.subr.mxu1 %v2961_v3 }
 0x37f   :  { %2622 = vmatpush3.msra.mxu1 %v3125_v32 }
 0x380   :  { %2623 = vmatprep.subr.mxu1 %v2961_v3 }
 0x381   :  { %2624 = vmatpush3.msra.mxu1 %v3130_v33 }
 0x382   :  { %2625 = vmatprep.subr.mxu1 %v2961_v3 }
 0x383   :  { %2626 = vmatpush3.msra.mxu1 %v3137_v34 }
 0x384   :  { %2627 = vmatprep.subr.mxu1 %v2961_v3 }
 0x385   :  { %2628 = vmatpush3.msra.mxu1 %v3144_v35 }
 0x386   :  { %2629 = vmatprep.subr.mxu1 %v2961_v3 }
 0x387   :  { %2630 = vmatpush3.msra.mxu1 %v3151_v36 }
 0x388   :  { %2631 = vmatprep.subr.mxu1 %v2961_v3 }
 0x389   :  { %2632 = vmatpush3.msra.mxu1 %v3158_v37 }
 0x38a   :  { %2633 = vmatprep.subr.mxu1 %v2961_v3 }
 0x38b   :  { %2634 = vmatpush3.msra.mxu1 %v3165_v38 }
 0x38c   :  { %2649 = vmatprep.subr.mxu1 %v2961_v3 }
 0x3bd   :  { %v875_v62 = vpop.f32.mrf.mxu0 }
 0x3be   :  { %v876_v63 = vadd.f32 %v3235_v60, %v875_v62 }
 0x3bf   :  { %v2588_v1 = vpop.f32.mrf.mxu0 }
 0x3c0   :  { %2879 = vtanh.f32 %v876_v63 }
 0x3cd   :  { %v2880_v2 = vpop.eup %2879 }
 0x3ce   :  { %1052 = vrot.lane.b32.xlu1 %v2880_v2, %s2963_s29 }
 0x434   :  { %v796_v5 = vpop.f32.mrf.mxu1 }
 0x435   :  { %v797_v16 = vadd.f32 %v3174_v39, %v796_v5 }
 0x436   :  { %v2569_v17 = vpop.f32.mrf.mxu1 }
 0x437   :  { %2881 = vtanh.f32 %v797_v16 }
 0x43c   :  { %v953_v18 = vpop.f32.mrf.mxu1 }
 0x43d   :  { %v958_v21 = vrot.slane %v953_v18, 4  ;;  %v959_v22 = vrot.slane %v953_v18, 5 }
 0x43e   :  { %v2599_v23 = vpop.f32.mrf.mxu1 }
 0x43f   :  { %v963_v24 = vadd.f32 %v959_v22, %v3093_v19  ;;  %v962_v25 = vadd.f32 %v958_v21, %v3095_v20 }
 0x440   :  { %v1053_v27 = vpop.permute.xlu1 %1052 }
 0x441   :  { %2883 = vtanh.f32 %v963_v24 }
 0x442   :  { %2885 = vtanh.f32 %v962_v25 }
 0x444   :  { %v2882_v26 = vpop.eup %2881 }
 0x445   :  { %v1055_v28 = vsel %vm133_vm4, %v2882_v26, %v1053_v27  ;;  %v971_v29 = vrot.slane %v2882_v26, 5 }
 0x446   :  { %2636 = vmatmul.mubr.msk.f32.vlgmr.msra.gmra.mxu1 %vm306_vm5, %v1055_v28 }
 0x447   :  { %972 = vrot.lane.b32.xlu0 %v971_v29, %s2963_s29  ;;  %2650 = vmatpush3.msra.mxu1 %v3037_v8 }
 0x448   :  { %2651 = vmatprep.subr.mxu1 %v2961_v3  ;;  %2665 = vmatprep.mubr.msk.f32.mxu1 %vm2962_vm2, %v2961_v3 }
 0x449   :  { %2652 = vmatpush3.msra.mxu1 %v3044_v9 }
 0x44a   :  { %2653 = vmatprep.subr.mxu1 %v2961_v3 }
 0x44b   :  { %2654 = vmatpush3.msra.mxu1 %v3051_v10 }
 0x44c   :  { %2655 = vmatprep.subr.mxu1 %v2961_v3 }
 0x44d   :  { %2656 = vmatpush3.msra.mxu1 %v3058_v11 }
 0x44e   :  { %2657 = vmatprep.subr.mxu1 %v2961_v3  ;;  %v2884_v30 = vpop.eup %2883 }
 0x44f   :  { %2658 = vmatpush3.msra.mxu1 %v3065_v12  ;;  %v1216_v40 = vrot.slane %v2884_v30, 7  ;;  %v2886_v41 = vpop.eup %2885  ;;  %v1133_v47 = vrot.slane %v2884_v30, 3 }
 0x450   :  { %2659 = vmatprep.subr.mxu1 %v2961_v3  ;;  %v1132_v46 = vrot.slane %v2886_v41, 4 }
 0x451   :  { %2660 = vmatpush3.msra.mxu1 %v3072_v13  ;;  %v3341_v42 = vsel %vm1217_vm9, %v1216_v40, %v2886_v41 }
 0x452   :  { %2661 = vmatprep.subr.mxu1 %v2961_v3  ;;  %v1134_v48 = vsel %vm218_vm3, %v1133_v47, %v1132_v46 }
 0x453   :  { %2662 = vmatpush3.msra.mxu1 %v3079_v14 }
 0x454   :  { %2663 = vmatprep.subr.mxu1 %v2961_v3 }
 0x455   :  { %2664 = vmatpush3.msra.mxu1 %v3086_v15 }
 0x456   :  { %2687 = vmatprep.subr.mxu1 %v2961_v3 }
 0x4b9   :  { %v973_v43 = vpop.permute.xlu0 %972 }
 0x4ba   :  { %v975_v44 = vsel %vm133_vm4, %v3285_v54, %v973_v43 }
 0x4bb   :  { %v977_v45 = vrot.slane %v975_v44, 3 }
 0x4bd   :  { %2617 = vmatmul.mubr.msk.f32.vlgmr.msra.gmra.mxu0 %vm306_vm5, %v977_v45 }
 0x4be   :  { %2639 = vmatpush3.msra.mxu0 %v2983_v0  ;;  %2646 = vmatprep.mubr.msk.f32.mxu0 %vm2962_vm2, %v2961_v3 }
 0x4bf   :  { %2640 = vmatprep.subr.mxu0 %v2961_v3 }
 0x4c0   :  { %2641 = vmatpush3.msra.mxu0 %v2995_v4 }
 0x4c1   :  { %2642 = vmatprep.subr.mxu0 %v2961_v3 }
 0x4c2   :  { %2643 = vmatpush3.msra.mxu0 %v3005_v6 }
 0x4c3   :  { %2644 = vmatprep.subr.mxu0 %v2961_v3 }
 0x4c4   :  { %2645 = vmatpush3.msra.mxu0 %v3012_v7 }
 0x4c5   :  { %2647 = vmatmul.mubr.msk.f32.vlgmr.msra.gmra.mxu0 %vm133_vm4, %v1134_v48  ;;  %2668 = vmatprep.subr.mxu0 %v2961_v3 }
 0x4c6   :  { %2669 = vmatpush3.msra.mxu0 %v3118_v31  ;;  %2684 = vmatprep.mubr.msk.f32.mxu0 %vm2962_vm2, %v2961_v3 }
 0x4c7   :  { %2670 = vmatprep.subr.mxu0 %v2961_v3 }
 0x4c8   :  { %2671 = vmatpush3.msra.mxu0 %v3125_v32 }
 0x4c9   :  { %2672 = vmatprep.subr.mxu0 %v2961_v3 }
 0x4ca   :  { %2673 = vmatpush3.msra.mxu0 %v3130_v33 }
 0x4cb   :  { %2674 = vmatprep.subr.mxu0 %v2961_v3 }
 0x4cc   :  { %2675 = vmatpush3.msra.mxu0 %v3137_v34 }
 0x4cd   :  { %2676 = vmatprep.subr.mxu0 %v2961_v3 }
 0x4ce   :  { %2677 = vmatpush3.msra.mxu0 %v3144_v35 }
 0x4cf   :  { %2678 = vmatprep.subr.mxu0 %v2961_v3 }
 0x4d0   :  { %2679 = vmatpush3.msra.mxu0 %v3151_v36 }
 0x4d1   :  { %2680 = vmatprep.subr.mxu0 %v2961_v3 }
 0x4d2   :  { %2681 = vmatpush3.msra.mxu0 %v3158_v37 }
 0x4d3   :  { %2682 = vmatprep.subr.mxu0 %v2961_v3 }
 0x4d4   :  { %2683 = vmatpush3.msra.mxu0 %v3165_v38 }
 0x4d5   :  { %2698 = vmatprep.subr.mxu0 %v2961_v3 }
 0x506   :  { %v1125_v49 = vpop.f32.mrf.mxu1 }
 0x507   :  { %v1126_v50 = vadd.f32 %v3235_v60, %v1125_v49 }
 0x508   :  { %v2637_v51 = vpop.f32.mrf.mxu1 }
 0x509   :  { %2887 = vtanh.f32 %v1126_v50 }
 0x516   :  { %v2888_v52 = vpop.eup %2887 }
 0x517   :  { %1302 = vrot.lane.b32.xlu1 %v2888_v52, %s2963_s29 }
 0x57d   :  { %v1046_v53 = vpop.f32.mrf.mxu0 }
 0x57e   :  { %v1047_v54 = vadd.f32 %v3174_v39, %v1046_v53 }
 0x57f   :  { %v2618_v55 = vpop.f32.mrf.mxu0 }
 0x580   :  { %2889 = vtanh.f32 %v1047_v54 }
 0x585   :  { %v1203_v56 = vpop.f32.mrf.mxu0 }
 0x586   :  { %v1208_v57 = vrot.slane %v1203_v56, 3  ;;  %v1209_v58 = vrot.slane %v1203_v56, 4 }
 0x587   :  { %v2648_v59 = vpop.f32.mrf.mxu0 }
 0x588   :  { %v1213_v61 = vadd.f32 %v1209_v58, %v3093_v19  ;;  %v1212_v62 = vadd.f32 %v1208_v57, %v3095_v20 }
 0x589   :  { %v1303_v1 = vpop.permute.xlu1 %1302 }
 0x58a   :  { %2891 = vtanh.f32 %v1213_v61 }
 0x58b   :  { %2893 = vtanh.f32 %v1212_v62 }
 0x58d   :  { %v2890_v63 = vpop.eup %2889 }
 0x58e   :  { %v1305_v2 = vsel %vm133_vm4, %v2890_v63, %v1303_v1  ;;  %v1221_v5 = vrot.slane %v2890_v63, 4 }
 0x58f   :  { %2685 = vmatmul.mubr.msk.f32.vlgmr.msra.gmra.mxu0 %vm306_vm5, %v1305_v2 }
 0x590   :  { %1222 = vrot.lane.b32.xlu0 %v1221_v5, %s2963_s29  ;;  %2699 = vmatpush3.msra.mxu0 %v3037_v8 }
 0x591   :  { %2700 = vmatprep.subr.mxu0 %v2961_v3  ;;  %2714 = vmatprep.mubr.msk.f32.mxu0 %vm2962_vm2, %v2961_v3 }
 0x592   :  { %2701 = vmatpush3.msra.mxu0 %v3044_v9 }
 0x593   :  { %2702 = vmatprep.subr.mxu0 %v2961_v3 }
 0x594   :  { %2703 = vmatpush3.msra.mxu0 %v3051_v10 }
 0x595   :  { %2704 = vmatprep.subr.mxu0 %v2961_v3 }
 0x596   :  { %2705 = vmatpush3.msra.mxu0 %v3058_v11 }
 0x597   :  { %2706 = vmatprep.subr.mxu0 %v2961_v3  ;;  %v2892_v16 = vpop.eup %2891 }
 0x598   :  { %2707 = vmatpush3.msra.mxu0 %v3065_v12  ;;  %v1466_v17 = vrot.slane %v2892_v16, 7  ;;  %v2894_v18 = vpop.eup %2893  ;;  %v1383_v26 = vrot.slane %v2892_v16, 4  ;;  %v2927_v16 = vld [vmem:[%s3646_s1 + $0x40] sm:$0xff] }
 0x599   :  { %2708 = vmatprep.subr.mxu0 %v2961_v3  ;;  %v1382_v25 = vrot.slane %v2894_v18, 5 }
 0x59a   :  { %2709 = vmatpush3.msra.mxu0 %v3072_v13  ;;  %v3402_v21 = vsel %vm1467_vm10, %v1466_v17, %v2894_v18  ;;  %v2928_v17 = vld [vmem:[%s3646_s1 + $0x38] sm:$0xff]  ;;  %v2929_v18 = vld [vmem:[%s3646_s1 + $0x30] sm:$0xff] }
 0x59b   :  { %2710 = vmatprep.subr.mxu0 %v2961_v3  ;;  %v1384_v27 = vsel %vm218_vm3, %v1383_v26, %v1382_v25 }
 0x59c   :  { %2711 = vmatpush3.msra.mxu0 %v3079_v14 }
 0x59d   :  { %2712 = vmatprep.subr.mxu0 %v2961_v3 }
 0x59e   :  { %2713 = vmatpush3.msra.mxu0 %v3086_v15 }
 0x59f   :  { %2736 = vmatprep.subr.mxu0 %v2961_v3 }
 0x602   :  { %v1223_v22 = vpop.permute.xlu0 %1222 }
 0x603   :  { %v1225_v23 = vsel %vm133_vm4, %v3341_v42, %v1223_v22 }
 0x604   :  { %v1227_v24 = vrot.slane %v1225_v23, 4 }
 0x606   :  { %2666 = vmatmul.mubr.msk.f32.vlgmr.msra.gmra.mxu1 %vm306_vm5, %v1227_v24 }
 0x607   :  { %2688 = vmatpush3.msra.mxu1 %v2983_v0  ;;  %2695 = vmatprep.mubr.msk.f32.mxu1 %vm2962_vm2, %v2961_v3 }
 0x608   :  { %2689 = vmatprep.subr.mxu1 %v2961_v3 }
 0x609   :  { %2690 = vmatpush3.msra.mxu1 %v2995_v4 }
 0x60a   :  { %2691 = vmatprep.subr.mxu1 %v2961_v3 }
 0x60b   :  { %2692 = vmatpush3.msra.mxu1 %v3005_v6 }
 0x60c   :  { %2693 = vmatprep.subr.mxu1 %v2961_v3 }
 0x60d   :  { %2694 = vmatpush3.msra.mxu1 %v3012_v7 }
 0x60e   :  { %2696 = vmatmul.mubr.msk.f32.vlgmr.msra.gmra.mxu1 %vm133_vm4, %v1384_v27  ;;  %2717 = vmatprep.subr.mxu1 %v2961_v3 }
 0x60f   :  { %2718 = vmatpush3.msra.mxu1 %v3118_v31  ;;  %2733 = vmatprep.mubr.msk.f32.mxu1 %vm2962_vm2, %v2961_v3 }
 0x610   :  { %2719 = vmatprep.subr.mxu1 %v2961_v3 }
 0x611   :  { %2720 = vmatpush3.msra.mxu1 %v3125_v32 }
 0x612   :  { %2721 = vmatprep.subr.mxu1 %v2961_v3 }
 0x613   :  { %2722 = vmatpush3.msra.mxu1 %v3130_v33 }
 0x614   :  { %2723 = vmatprep.subr.mxu1 %v2961_v3 }
 0x615   :  { %2724 = vmatpush3.msra.mxu1 %v3137_v34 }
 0x616   :  { %2725 = vmatprep.subr.mxu1 %v2961_v3 }
 0x617   :  { %2726 = vmatpush3.msra.mxu1 %v3144_v35 }
 0x618   :  { %2727 = vmatprep.subr.mxu1 %v2961_v3 }
 0x619   :  { %2728 = vmatpush3.msra.mxu1 %v3151_v36 }
 0x61a   :  { %2729 = vmatprep.subr.mxu1 %v2961_v3 }
 0x61b   :  { %2730 = vmatpush3.msra.mxu1 %v3158_v37 }
 0x61c   :  { %2731 = vmatprep.subr.mxu1 %v2961_v3 }
 0x61d   :  { %2732 = vmatpush3.msra.mxu1 %v3165_v38 }
 0x61e   :  { %2747 = vmatprep.subr.mxu1 %v2961_v3 }
 0x64f   :  { %v1375_v0 = vpop.f32.mrf.mxu0 }
 0x650   :  { %v1376_v28 = vadd.f32 %v3235_v60, %v1375_v0 }
 0x651   :  { %v2686_v29 = vpop.f32.mrf.mxu0 }
 0x652   :  { %2895 = vtanh.f32 %v1376_v28 }
 0x65f   :  { %v2896_v30 = vpop.eup %2895 }
 0x660   :  { %1552 = vrot.lane.b32.xlu1 %v2896_v30, %s2963_s29 }
 0x6c6   :  { %v1296_v40 = vpop.f32.mrf.mxu1 }
 0x6c7   :  { %v1297_v41 = vadd.f32 %v3174_v39, %v1296_v40 }
 0x6c8   :  { %v2667_v42 = vpop.f32.mrf.mxu1 }
 0x6c9   :  { %2897 = vtanh.f32 %v1297_v41 }
 0x6ce   :  { %v1453_v43 = vpop.f32.mrf.mxu1 }
 0x6cf   :  { %v1458_v44 = vrot.slane %v1453_v43, 2  ;;  %v1459_v45 = vrot.slane %v1453_v43, 3 }
 0x6d0   :  { %v2697_v46 = vpop.f32.mrf.mxu1 }
 0x6d1   :  { %v1463_v47 = vadd.f32 %v1459_v45, %v3093_v19  ;;  %v1462_v48 = vadd.f32 %v1458_v44, %v3095_v20 }
 0x6d2   :  { %v1553_v50 = vpop.permute.xlu1 %1552 }
 0x6d3   :  { %2899 = vtanh.f32 %v1463_v47 }
 0x6d4   :  { %2901 = vtanh.f32 %v1462_v48 }
 0x6d6   :  { %v2898_v49 = vpop.eup %2897 }
 0x6d7   :  { %v1555_v51 = vsel %vm133_vm4, %v2898_v49, %v1553_v50  ;;  %v1471_v52 = vrot.slane %v2898_v49, 3 }
 0x6d8   :  { %2734 = vmatmul.mubr.msk.f32.vlgmr.msra.gmra.mxu1 %vm306_vm5, %v1555_v51 }
 0x6d9   :  { %1472 = vrot.lane.b32.xlu0 %v1471_v52, %s2963_s29  ;;  %2748 = vmatpush3.msra.mxu1 %v3037_v8  ;;  %v2932_v52 = vld [vmem:[%s3646_s1 + $0xa0] sm:$0xff] }
 0x6da   :  { %2749 = vmatprep.subr.mxu1 %v2961_v3  ;;  %2763 = vmatprep.mubr.msk.f32.mxu1 %vm2962_vm2, %v2961_v3 }
 0x6db   :  { %2750 = vmatpush3.msra.mxu1 %v3044_v9 }
 0x6dc   :  { %2751 = vmatprep.subr.mxu1 %v2961_v3 }
 0x6dd   :  { %2752 = vmatpush3.msra.mxu1 %v3051_v10 }
 0x6de   :  { %2753 = vmatprep.subr.mxu1 %v2961_v3 }
 0x6df   :  { %2754 = vmatpush3.msra.mxu1 %v3058_v11 }
 0x6e0   :  { %2755 = vmatprep.subr.mxu1 %v2961_v3  ;;  %v2900_v53 = vpop.eup %2899 }
 0x6e1   :  { %2756 = vmatpush3.msra.mxu1 %v3065_v12  ;;  %v1716_v8 = vrot.slane %v2900_v53, 7  ;;  %v2902_v54 = vpop.eup %2901 }
 0x6e2   :  { %2757 = vmatprep.subr.mxu1 %v2961_v3 }
 0x6e3   :  { %2758 = vmatpush3.msra.mxu1 %v3072_v13  ;;  %v3463_v9 = vsel %vm1717_vm11, %v1716_v8, %v2902_v54  ;;  %v2921_v13 = vld [vmem:[%s3646_s1 + $0x20] sm:$0xff]  ;;  %v2934_v8 = vld [vmem:[%s3646_s1 + $0x90] sm:$0xff] }
 0x6e4   :  { %2759 = vmatprep.subr.mxu1 %v2961_v3 }
 0x6e5   :  { %2760 = vmatpush3.msra.mxu1 %v3079_v14  ;;  %v1632_v14 = vrot.slane %v2902_v54, 6  ;;  %v2935_v54 = vld [vmem:[%s3646_s1 + $0x88] sm:$0xff] }
 0x6e6   :  { %2761 = vmatprep.subr.mxu1 %v2961_v3 }
 0x6e7   :  { %2762 = vmatpush3.msra.mxu1 %v3086_v15  ;;  %v1633_v15 = vrot.slane %v2900_v53, 5  ;;  %v2933_v53 = vld [vmem:[%s3646_s1 + $0x98] sm:$0xff] }
 0x6e8   :  { %2785 = vmatprep.subr.mxu1 %v2961_v3 }
 0x6e9   :  { %v1634_v55 = vsel %vm218_vm3, %v1633_v15, %v1632_v14 }
 0x74b   :  { %v1473_v10 = vpop.permute.xlu0 %1472 }
 0x74c   :  { %v1475_v11 = vsel %vm133_vm4, %v3402_v21, %v1473_v10  ;;  %v2937_v10 = vld [vmem:[%s3646_s1 + $0x78] sm:$0xff] }
 0x74d   :  { %v1477_v12 = vrot.slane %v1475_v11, 5 }
 0x74f   :  { %2715 = vmatmul.mubr.msk.f32.vlgmr.msra.gmra.mxu0 %vm306_vm5, %v1477_v12 }
 0x750   :  { %2737 = vmatpush3.msra.mxu0 %v2921_v13  ;;  %2744 = vmatprep.mubr.msk.f32.mxu0 %vm2962_vm2, %v2961_v3 }
 0x751   :  { %2738 = vmatprep.subr.mxu0 %v2961_v3 }
 0x752   :  { %2739 = vmatpush3.msra.mxu0 %v2995_v4 }
 0x753   :  { %2740 = vmatprep.subr.mxu0 %v2961_v3 }
 0x754   :  { %2741 = vmatpush3.msra.mxu0 %v3005_v6 }
 0x755   :  { %2742 = vmatprep.subr.mxu0 %v2961_v3 }
 0x756   :  { %2743 = vmatpush3.msra.mxu0 %v3012_v7 }
 0x757   :  { %2745 = vmatmul.mubr.msk.f32.vlgmr.msra.gmra.mxu0 %vm133_vm4, %v1634_v55  ;;  %2766 = vmatprep.subr.mxu0 %v2961_v3  ;;  %v2938_v55 = vld [vmem:[%s3646_s1 + $0x70] ss:$0 sm:$0xff] }
 0x758   :  { %2767 = vmatpush3.msra.mxu0 %v3118_v31  ;;  %2782 = vmatprep.mubr.msk.f32.mxu0 %vm2962_vm2, %v2961_v3 }
 0x759   :  { %2768 = vmatprep.subr.mxu0 %v2961_v3 }
 0x75a   :  { %2769 = vmatpush3.msra.mxu0 %v3125_v32 }
 0x75b   :  { %2770 = vmatprep.subr.mxu0 %v2961_v3 }
 0x75c   :  { %2771 = vmatpush3.msra.mxu0 %v3130_v33 }
 0x75d   :  { %2772 = vmatprep.subr.mxu0 %v2961_v3 }
 0x75e   :  { %2773 = vmatpush3.msra.mxu0 %v3137_v34 }
 0x75f   :  { %2774 = vmatprep.subr.mxu0 %v2961_v3 }
 0x760   :  { %2775 = vmatpush3.msra.mxu0 %v3144_v35 }
 0x761   :  { %2776 = vmatprep.subr.mxu0 %v2961_v3 }
 0x762   :  { %2777 = vmatpush3.msra.mxu0 %v3151_v36 }
 0x763   :  { %2778 = vmatprep.subr.mxu0 %v2961_v3 }
 0x764   :  { %2779 = vmatpush3.msra.mxu0 %v3158_v37 }
 0x765   :  { %2780 = vmatprep.subr.mxu0 %v2961_v3 }
 0x766   :  { %2781 = vmatpush3.msra.mxu0 %v3165_v38 }
 0x767   :  { %2804 = vmatprep.subr.mxu0 %v2961_v3 }
 0x798   :  { %v1625_v4 = vpop.f32.mrf.mxu1 }
 0x799   :  { %v1626_v6 = vadd.f32 %v3235_v60, %v1625_v4 }
 0x79a   :  { %v2735_v7 = vpop.f32.mrf.mxu1 }
 0x79b   :  { %2903 = vtanh.f32 %v1626_v6 }
 0x7a8   :  { %v2904_v56 = vpop.eup %2903 }
 0x7a9   :  { %1802 = vrot.lane.b32.xlu1 %v2904_v56, %s2963_s29 }
 0x80f   :  { %v1546_v57 = vpop.f32.mrf.mxu0 }
 0x810   :  { %v1547_v58 = vadd.f32 %v3174_v39, %v1546_v57 }
 0x811   :  { %v2716_v59 = vpop.f32.mrf.mxu0 }
 0x812   :  { %2905 = vtanh.f32 %v1547_v58  ;;  %v39_v58 = vld [vmem:[%s3646_s1 + $0xd8] sm:$0xff]  ;;  %v38_v59 = vld [vmem:[%s3646_s1 + $0xd0] sm:$0xff] }
 0x817   :  { %v3507_v61 = vpop.f32.mrf.mxu0 }
 0x818   :  { %v1709_v40 = vrot.slane %v3507_v61, 2  ;;  %v1708_v41 = vrot.slane %v3507_v61, 1  ;;  %v37_v61 = vld [vmem:[%s3646_s1 + $0xc8] sm:$0xff] }
 0x819   :  { %v2746_v62 = vpop.f32.mrf.mxu0 }
 0x81a   :  { %v1712_v42 = vadd.f32 %v1708_v41, %v3095_v20  ;;  %v2931_v20 = vld [vmem:[%s3646_s1 + $0xa8] sm:$0xff]  ;;  %v36_v62 = vld [vmem:[%s3646_s1 + $0xc0] sm:$0xff] }
 0x81b   :  { %v1803_v1 = vpop.permute.xlu1 %1802 }
 0x81f   :  { %v2906_v63 = vpop.eup %2905 }
 0x820   :  { %v1805_v2 = vsel %vm133_vm4, %v2906_v63, %v1803_v1  ;;  %v1721_v5 = vrot.slane %v2906_v63, 2 }
 0x821   :  { %2783 = vmatmul.mubr.msk.f32.vlgmr.msra.gmra.mxu0 %vm306_vm5, %v1805_v2 }
 0x822   :  { %1722 = vrot.lane.b32.xlu0 %v1721_v5, %s2963_s29  ;;  %2805 = vmatpush3.msra.mxu0 %v3118_v31 }
 0x823   :  { %2806 = vmatprep.subr.mxu0 %v2961_v3  ;;  %2820 = vmatprep.mubr.msk.f32.mxu0 %vm2962_vm2, %v2961_v3 }
 0x824   :  { %2807 = vmatpush3.msra.mxu0 %v3125_v32 }
 0x825   :  { %2808 = vmatprep.subr.mxu0 %v2961_v3 }
 0x826   :  { %2809 = vmatpush3.msra.mxu0 %v3130_v33 }
 0x827   :  { %2810 = vmatprep.subr.mxu0 %v2961_v3 }
 0x828   :  { %2811 = vmatpush3.msra.mxu0 %v3137_v34  ;;  %v2922_v34 = vld [vmem:[%s3646_s1 + $0x68] sm:$0xff] }
 0x829   :  { %2812 = vmatprep.subr.mxu0 %v2961_v3 }
 0x82a   :  { %2813 = vmatpush3.msra.mxu0 %v3144_v35  ;;  %v2923_v35 = vld [vmem:[%s3646_s1 + $0x60] sm:$0xff] }
 0x82b   :  { %2814 = vmatprep.subr.mxu0 %v2961_v3 }
 0x82c   :  { %2815 = vmatpush3.msra.mxu0 %v3151_v36  ;;  %v2924_v36 = vld [vmem:[%s3646_s1 + $0x58] sm:$0xff] }
 0x82d   :  { %2816 = vmatprep.subr.mxu0 %v2961_v3 }
 0x82e   :  { %2817 = vmatpush3.msra.mxu0 %v3158_v37  ;;  %v2925_v37 = vld [vmem:[%s3646_s1 + $0x50] sm:$0xff] }
 0x82f   :  { %2818 = vmatprep.subr.mxu0 %v2961_v3 }
 0x830   :  { %2819 = vmatpush3.msra.mxu0 %v3165_v38  ;;  %v2926_v38 = vld [vmem:[%s3646_s1 + $0x48] sm:$0xff] }
 0x831   :  { %2842 = vmatprep.subr.mxu0 %v2961_v3 }
 0x894   :  { %v1723_v31 = vpop.permute.xlu0 %1722 }
 0x895   :  { %v1725_v32 = vsel %vm133_vm4, %v3463_v9, %v1723_v31  ;;  %v2936_v9 = vld [vmem:[%s3646_s1 + $0x80] sm:$0xff] }
 0x896   :  { %v1727_v33 = vrot.slane %v1725_v32, 6  ;;  %v2251_v31 = vld [vmem:[%s3646_s1 + $0xe0] ss:$0 sm:$0xff] }
 0x898   :  { %2764 = vmatmul.mubr.msk.f32.vlgmr.msra.gmra.mxu1 %vm306_vm5, %v1727_v33 }
 0x899   :  { %2786 = vmatpush3.msra.mxu1 %v2922_v34  ;;  %2801 = vmatprep.mubr.msk.f32.mxu1 %vm2962_vm2, %v2961_v3 }
 0x89a   :  { %2787 = vmatprep.subr.mxu1 %v2961_v3 }
 0x89b   :  { %2788 = vmatpush3.msra.mxu1 %v2923_v35 }
 0x89c   :  { %2789 = vmatprep.subr.mxu1 %v2961_v3 }
 0x89d   :  { %2790 = vmatpush3.msra.mxu1 %v2924_v36 }
 0x89e   :  { %2791 = vmatprep.subr.mxu1 %v2961_v3 }
 0x89f   :  { %2792 = vmatpush3.msra.mxu1 %v2925_v37 }
 0x8a0   :  { %2793 = vmatprep.subr.mxu1 %v2961_v3 }
 0x8a1   :  { %2794 = vmatpush3.msra.mxu1 %v2926_v38 }
 0x8a2   :  { %2795 = vmatprep.subr.mxu1 %v2961_v3 }
 0x8a3   :  { %2796 = vmatpush3.msra.mxu1 %v2927_v16 }
 0x8a4   :  { %2797 = vmatprep.subr.mxu1 %v2961_v3 }
 0x8a5   :  { %2798 = vmatpush3.msra.mxu1 %v2928_v17 }
 0x8a6   :  { %2799 = vmatprep.subr.mxu1 %v2961_v3 }
 0x8a7   :  { %2800 = vmatpush3.msra.mxu1 %v2929_v18 }
 0x8a8   :  { %2823 = vmatprep.subr.mxu1 %v2961_v3 }
 0x8e1   :  { %v1875_v21 = vpop.f32.mrf.mxu0 }
 0x8e2   :  { %v1876_v22 = vadd.f32 %v3235_v60, %v1875_v21 }
 0x8e3   :  { %v2784_v23 = vpop.f32.mrf.mxu0 }
 0x8e4   :  { %2907 = vtanh.f32 %v1876_v22 }
 0x8f1   :  { %v2908_v24 = vpop.eup %2907 }
 0x8f2   :  { %1972 = vrot.lane.b32.xlu1 %v2908_v24, %s2963_s29 }
 0x958   :  { %v1796_v25 = vpop.f32.mrf.mxu1 }
 0x959   :  { %v1797_v26 = vadd.f32 %v3174_v39, %v1796_v25  ;;  %v1713_v39 = vadd.f32 %v1709_v40, %v3093_v19  ;;  %v2930_v19 = vld [vmem:[%s3646_s1 + $0xb0] sm:$0xff] }
 0x95a   :  { %v2765_v27 = vpop.f32.mrf.mxu1 }
 0x95b   :  { %2909 = vtanh.f32 %v1797_v26 }
 0x95c   :  { %2911 = vtanh.f32 %v1713_v39 }
 0x95d   :  { %2913 = vtanh.f32 %v1712_v42 }
 0x964   :  { %v1973_v28 = vpop.permute.xlu1 %1972 }
 0x968   :  { %v2910_v0 = vpop.eup %2909 }
 0x969   :  { %v1975_v29 = vsel %vm133_vm4, %v2910_v0, %v1973_v28  ;;  %v1886_v30 = vrot.slane %v2910_v0, 1  ;;  %v2912_v43 = vpop.eup %2911 }
 0x96a   :  { %2821 = vmatmul.mubr.msk.f32.vlgmr.msra.gmra.mxu0 %vm306_vm5, %v1975_v29  ;;  %v1882_v44 = vrot.slane %v2912_v43, 7  ;;  %v2914_v45 = vpop.eup %2913 }
 0x96b   :  { %1887 = vrot.lane.b32.xlu0 %v1886_v30, %s2963_s29  ;;  %2850 = vmatprep.mubr.msk.f32.mxu0 %vm2962_vm2, %v2961_v3 }
 0x96c   :  { %2843 = vmatpush3.msra.mxu0 %v39_v58 }
 0x96d   :  { %2844 = vmatprep.subr.mxu0 %v2961_v3 }
 0x96e   :  { %2845 = vmatpush3.msra.mxu0 %v38_v59 }
 0x96f   :  { %2846 = vmatprep.subr.mxu0 %v2961_v3 }
 0x970   :  { %2847 = vmatpush3.msra.mxu0 %v37_v61 }
 0x971   :  { %2848 = vmatprep.subr.mxu0 %v2961_v3 }
 0x972   :  { %2849 = vmatpush3.msra.mxu0 %v36_v62 }
 0x9dd   :  { %v1888_v46 = vpop.permute.xlu0 %1887 }
 0x9de   :  { %v1890_v47 = vsel %vm133_vm4, %v2914_v45, %v1888_v46  ;;  %v1891_v48 = vsel %vm133_vm4, %v1882_v44, %v1888_v46 }
 0x9df   :  { %v1895_v49 = vrot.slane %v1890_v47, 7  ;;  %v1896_v50 = vrot.slane %v1891_v48, 7 }
 0x9e1   :  { %v1897_v51 = vsel %vm1894_vm12, %v1895_v49, %v1896_v50 }
 0x9e2   :  { %2802 = vmatmul.mubr.msk.f32.vlgmr.msra.gmra.mxu1 %vm306_vm5, %v1897_v51 }
 0x9e3   :  { %2824 = vmatpush3.msra.mxu1 %v2930_v19  ;;  %2839 = vmatprep.mubr.msk.f32.mxu1 %vm2962_vm2, %v2961_v3 }
 0x9e4   :  { %2825 = vmatprep.subr.mxu1 %v2961_v3 }
 0x9e5   :  { %2826 = vmatpush3.msra.mxu1 %v2931_v20 }
 0x9e6   :  { %2827 = vmatprep.subr.mxu1 %v2961_v3 }
 0x9e7   :  { %2828 = vmatpush3.msra.mxu1 %v2932_v52 }
 0x9e8   :  { %2829 = vmatprep.subr.mxu1 %v2961_v3 }
 0x9e9   :  { %2830 = vmatpush3.msra.mxu1 %v2933_v53 }
 0x9ea   :  { %2831 = vmatprep.subr.mxu1 %v2961_v3 }
 0x9eb   :  { %2832 = vmatpush3.msra.mxu1 %v2934_v8 }
 0x9ec   :  { %2833 = vmatprep.subr.mxu1 %v2961_v3 }
 0x9ed   :  { %2834 = vmatpush3.msra.mxu1 %v2935_v54 }
 0x9ee   :  { %2835 = vmatprep.subr.mxu1 %v2961_v3 }
 0x9ef   :  { %2836 = vmatpush3.msra.mxu1 %v2936_v9 }
 0x9f0   :  { %2837 = vmatprep.subr.mxu1 %v2961_v3 }
 0x9f1   :  { %2838 = vmatpush3.msra.mxu1 %v2937_v10 }
 0xa2a   :  { %v2045_v11 = vpop.f32.mrf.mxu0 }
 0xa2b   :  { %v2046_v12 = vadd.f32 %v3235_v60, %v2045_v11 }
 0xa2c   :  { %v2822_v13 = vpop.f32.mrf.mxu0 }
 0xa2d   :  { %2915 = vtanh.f32 %v2046_v12 }
 0xa3a   :  { %v2916_v14 = vpop.eup %2915 }
 0xa3b   :  { %2051 = vrot.lane.b32.xlu1 %v2916_v14, %s2963_s29 }
 0xaa2   :  { %v1966_v15 = vpop.f32.mrf.mxu1 }
 0xaa3   :  { %v1967_v4 = vadd.f32 %v2938_v55, %v1966_v15 }
 0xaa4   :  { %v2803_v6 = vpop.f32.mrf.mxu1 }
 0xaa5   :  { %2917 = vtanh.f32 %v1967_v4 }
 0xaad   :  { %v2052_v56 = vpop.permute.xlu1 %2051 }
 0xab2   :  { %v2918_v7 = vpop.eup %2917 }
 0xab3   :  { %v2054_v57 = vsel %vm133_vm4, %v2918_v7, %v2052_v56 }
 0xab4   :  { %2840 = vmatmul.mubr.msk.f32.vlgmr.msra.gmra.mxu1 %vm306_vm5, %v2054_v57 }
 0xb74   :  { %v2124_v63 = vpop.f32.mrf.mxu1 }
 0xb75   :  { %v2125_v1 = vadd.f32 %v3235_v60, %v2124_v63 }
 0xb76   :  { %v2841_v2 = vpop.f32.mrf.mxu1 }
 0xb77   :  { %2919 = vtanh.f32 %v2125_v1 }
 0xb84   :  { %v2920_v5 = vpop.eup %2919 }
 0xb85   :  { %2851 = vmatmul.mubr.msk.f32.vlgmr.msra.gmra.mxu0 %vm133_vm4, %v2920_v5 }
 0xc45   :  { %v2202_v32 = vpop.f32.mrf.mxu0 }
 0xc46   :  { %v2203_v33 = vadd.f32 %v2251_v31, %v2202_v32 }
 0xc47   :  { %v2852_v3 = vpop.f32.mrf.mxu0 }
 0xc48   :  { %2207 = vst.msk [vmem:[#allocation2] sm:$0x3] %vm2206_vm13, %v2203_v33 }
 0xc49   :  { %2950 = shalt.err (!%p2947_p4)
}
 0xc4a   :  { %2217 = dma.vmem_to_hbm [thread:$0]  %s2215_s22, 32, %s3647_s2, [#allocation3]  }
 0xc4b   :  { %2959 = dma.done.wait [#allocation3], 32  }
 0xc4c   :  { %2960 = vsyncadd [#allocation3], 4294967264 }
 0xc4d   :  { %2221 = vsyncpa [#allocation3], 1 }

</bundles_post_ra>
